<compile_context>
chip_gen: v7x
topology: tpu7x:2x2x1
jax: 0.10.0
libtpu: 0.0.40
codegen_flags: <defaults>
</compile_context>

<pallas_src>
import functools

import jax
import jax.numpy as jnp
from jax import lax
from jax.experimental import pallas as pl
from jax.experimental.pallas import tpu as pltpu


def _round_up(x, m):
    return ((x + m - 1) // m) * m


def _make_vmem_gather_kernel(tile_m):
    """Small-vocab path: table resident in VMEM, per-row vector gather."""

    def kernel(ids_ref, table_ref, out_ref):
        # ids_ref:   SMEM (n_pad,) int32 -- scalar-prefetched flat indices
        # table_ref: VMEM (vocab, dim)   -- full table, resident across steps
        # out_ref:   VMEM (tile_m, dim)  -- pipelined output block
        base = pl.program_id(0) * tile_m

        def body(j, carry):
            row = ids_ref[base + j]
            out_ref[pl.ds(j, 1), :] = table_ref[pl.ds(row, 1), :]
            return carry

        lax.fori_loop(0, tile_m, body, 0)

    return kernel


def _make_hbm_gather_kernel(tile_m):
    """Large-vocab path: table stays in HBM, rows DMAed straight into out_ref."""

    def kernel(ids_ref, table_ref, out_ref, sem):
        # ids_ref:   SMEM (n_pad,) int32  -- scalar-prefetched flat indices
        # table_ref: HBM  (vocab, dim)    -- raw ref, no automatic DMA
        # out_ref:   VMEM (tile_m, dim)   -- pipelined output block (DMA dst)
        # sem:       one shared DMA semaphore (all row copies signal it)
        base = pl.program_id(0) * tile_m

        def start(j, carry):
            row = ids_ref[base + j]
            pltpu.make_async_copy(
                table_ref.at[pl.ds(row, 1), :],
                out_ref.at[pl.ds(j, 1), :],
                sem,
            ).start()
            return carry

        lax.fori_loop(0, tile_m, start, 0)

        def wait(j, carry):
            # Reconstruct with the same row slice so shapes match the start.
            row = ids_ref[base + j]
            pltpu.make_async_copy(
                table_ref.at[pl.ds(row, 1), :],
                out_ref.at[pl.ds(j, 1), :],
                sem,
            ).wait()
            return carry

        lax.fori_loop(0, tile_m, wait, 0)

    return kernel


@functools.partial(jax.jit, static_argnames=("tile_m", "max_vmem_table_bytes"))
def embedding_forward(indices, weight, *, tile_m=512,
                      max_vmem_table_bytes=8 * 1024 * 1024):
    """indices: int array, any shape; weight: (num_embeddings, dim)."""
    vocab, dim = weight.shape
    itemsize = jnp.dtype(weight.dtype).itemsize
    idx_shape = indices.shape

    flat = indices.reshape(-1).astype(jnp.int32)
    flat = jnp.clip(flat, 0, vocab - 1)            # never issue an OOB HBM DMA
    n = flat.shape[0]

    # ---- row-tile selection (multiple of 8 sublanes, >= 2 grid steps if we can) ----
    tm = max(8, min(int(tile_m), _round_up(n, 8)))
    tm = _round_up(tm, 8)
    if _round_up(n, 8) >= 16 and _round_up(n, tm) // tm < 2:
        tm = _round_up(max(8, _round_up(n, 8) // 2), 8)   # keep both v7x TCs busy
    n_pad = _round_up(n, tm)
    if n_pad != n:
        flat = jnp.pad(flat, (0, n_pad - n))       # pad with row 0 (always valid)
    grid = (n_pad // tm,)

    table_bytes = int(vocab) * int(dim) * itemsize
    out_block_bytes = tm * int(dim) * itemsize

    if table_bytes <= max_vmem_table_bytes:
        # -------- fast path: whole table resident in VMEM, no per-row DMAs --------
        vmem_limit = int(2 * table_bytes + 4 * out_block_bytes + (4 << 20))
        out = pl.pallas_call(
            _make_vmem_gather_kernel(tm),
            out_shape=jax.ShapeDtypeStruct((n_pad, dim), weight.dtype),
            grid_spec=pltpu.PrefetchScalarGridSpec(
                num_scalar_prefetch=1,                          # indices -> SMEM
                grid=grid,
                in_specs=[pl.BlockSpec((vocab, dim), lambda i, ids: (0, 0))],
                out_specs=pl.BlockSpec((tm, dim), lambda i, ids: (i, 0)),
            ),
            compiler_params=pltpu.CompilerParams(
                dimension_semantics=("parallel",),
                vmem_limit_bytes=vmem_limit),
        )(flat, weight)
    else:
        # -------- HBM path: DMA gathered rows straight into the output block --------
        vmem_limit = int(4 * out_block_bytes + (4 << 20))
        out = pl.pallas_call(
            _make_hbm_gather_kernel(tm),
            out_shape=jax.ShapeDtypeStruct((n_pad, dim), weight.dtype),
            grid_spec=pltpu.PrefetchScalarGridSpec(
                num_scalar_prefetch=1,                          # indices -> SMEM
                grid=grid,
                in_specs=[pl.BlockSpec(memory_space=pl.ANY)],   # table stays in HBM
                out_specs=pl.BlockSpec((tm, dim), lambda i, ids: (i, 0)),
                scratch_shapes=[pltpu.SemaphoreType.DMA],       # one shared DMA sem
            ),
            compiler_params=pltpu.CompilerParams(
                dimension_semantics=("parallel",),
                vmem_limit_bytes=vmem_limit),
        )(flat, weight)

    return out[:n].reshape(*idx_shape, dim)


def _xavier_uniform_leaky(key, num_embeddings, dim, negative_slope=0.1):
    # Matches Embedding.reset_parameters: xavier_uniform_ with
    # gain = calculate_gain('leaky_relu', 0.1) = sqrt(2 / (1 + 0.1**2)).
    gain = (2.0 / (1.0 + negative_slope ** 2)) ** 0.5
    bound = gain * (6.0 / (num_embeddings + dim)) ** 0.5
    return jax.random.uniform(key, (num_embeddings, dim), jnp.float32,
                              minval=-bound, maxval=bound)


if __name__ == "__main__":
    key = jax.random.PRNGKey(0)
    k_idx, k_w = jax.random.split(key)

    batch, seq = 2, 8
    vocab, dim = 32, 128          # dim multiple of 128 keeps output stores lane-dense

    indices = jax.random.randint(k_idx, (batch, seq), 0, vocab, dtype=jnp.int32)
    weight = _xavier_uniform_leaky(k_w, vocab, dim)

    # Reference: plain JAX embedding lookup.
    ref = jnp.take(weight, indices, axis=0)

    # Fast path: small table -> resident in VMEM.
    out_fast = embedding_forward(indices, weight)
    out_fast = jax.block_until_ready(out_fast)
    assert out_fast.shape == (batch, seq, dim)
    assert jnp.allclose(out_fast, ref)

    # HBM path: force the DMA-gather code path (as used for large vocabularies).
    out_hbm = embedding_forward(indices, weight, max_vmem_table_bytes=0)
    out_hbm = jax.block_until_ready(out_hbm)
    assert out_hbm.shape == (batch, seq, dim)
    assert jnp.allclose(out_hbm, ref)

    print("KERNEL_OK")
</pallas_src>

<mosaic_0001>
module attributes {stable_mosaic.version = 11 : i64} {
  func.func @kernel(%arg0: i32, %arg1: memref<16xi32, #tpu.memory_space<smem>>, %arg2: memref<32x128xf32, #tpu.memory_space<vmem>>, %arg3: memref<8x128xf32, #tpu.memory_space<vmem>>) attributes {dimension_semantics = [#tpu.dimension_semantics<parallel>], iteration_bounds = array<i64: 2>, scalar_prefetch = 1 : i64, scratch_operands = 0 : i64, tpu.core_type = #tpu.core_type<tc>, window_params = [{pipeline_mode = #tpu.pipeline_mode<synchronous>, transform_indices = @transform_0, window_bounds = array<i64: 32, 128>}, {transform_indices = @transform_1, window_bounds = array<i64: 8, 128>}]} {
    %c8_i32 = arith.constant 8 : i32
    %0 = arith.muli %arg0, %c8_i32 : i32
    %c0_i32 = arith.constant 0 : i32
    %c8_i32_0 = arith.constant 8 : i32
    %1 = arith.addi %c0_i32, %c8_i32_0 : i32
    %c1_i32 = arith.constant 1 : i32
    scf.for %arg4 = %c0_i32 to %1 step %c1_i32  : i32 {
      %2 = arith.addi %0, %arg4 : i32
      %3 = arith.index_cast %2 : i32 to index
      %4 = memref.load %arg1[%3] : memref<16xi32, #tpu.memory_space<smem>>
      %5 = arith.index_cast %4 : i32 to index
      %c0 = arith.constant 0 : index
      %6 = vector.load %arg2[%5, %c0] : memref<32x128xf32, #tpu.memory_space<vmem>>, vector<1x128xf32>
      %7 = arith.index_cast %arg4 : i32 to index
      %c0_2 = arith.constant 0 : index
      %8 = vector.load %arg3[%7, %c0_2] : memref<8x128xf32, #tpu.memory_space<vmem>>, vector<1x128xf32>
      tpu.vector_store %arg3[%7, %c0_2], %6 {strides = array<i32>} : memref<8x128xf32, #tpu.memory_space<vmem>>, vector<1x128xf32>,
    }
    %c8_i32_1 = arith.constant 8 : i32
    return
  }
  func.func @transform_0(%arg0: i32, %arg1: memref<16xi32, #tpu.memory_space<smem>>) -> (i32, i32) {
    %c0_i32 = arith.constant 0 : i32
    %c0_i32_0 = arith.constant 0 : i32
    %c0_i32_1 = arith.constant 0 : i32
    return %c0_i32, %c0_i32_0 : i32, i32
  }
  func.func @transform_1(%arg0: i32, %arg1: memref<16xi32, #tpu.memory_space<smem>>) -> (i32, i32) {
    %c0_i32 = arith.constant 0 : i32
    %c0_i32_0 = arith.constant 0 : i32
    return %arg0, %c0_i32 : i32, i32
  }
}

</mosaic_0001>

<bundles_post_ra>
// kernel: embedding_forward.1
= control target key start
LH: loop header
LB: loop body
LE: loop exit
PB: predicated region body
PF: predicated region fallthrough
CT: control target
= control target key end

     0   :  { %s548_s0 = inlined_call_operand.vmem [shape: s32[16], index: 0, kind: input, shape index: {}]   ;;  %s549_s1 = inlined_call_operand.hbm [shape: f32[32,128], index: 1, kind: input, shape index: {}]   ;;  %s550_s2 = inlined_call_operand.hbm [shape: f32[16,128], index: 2, kind: output, shape index: {}]  }
   0x1   :  { %s7_s11 = sshll.u32 %s548_s0, 4  ;;  %s8_s11 = int_to_ptr.vmem [resolvable:$true] %s7_s11 }
   0x2   :  { %s282_s12 = scalar_lea.vmem %s8_s11, 16  ;;  %p287_p1 = scmp.lt.s32.totalorder %s8_s11, %s8_s11 }
   0x3   :  { %p283_p0 = scmp.ne.s32.totalorder %s8_s11, %s282_s12  ;;  %p288_p2 = scmp.lt.s32.totalorder %s282_s12, %s282_s12 }
   0x5   :  { %p289_p3 = por %p288_p2, %p287_p1 }
   0x7   :  { %p290_p4 = pnand %p289_p3, %p283_p0 }
   0x9   :  { %293 = shalt.err (!%p290_p4)  }
   0xa   :  { %s400_s13 = smov [#allocation3]  }
   0xb   :  { %10 = dma.vmem_to_smem %s8_s11, 16, %s400_s13, [#allocation2] }
   0xc   :  { %370 = dma.done.wait [#allocation2], 16 }
   0xd   :  { %371 = vsyncadd [#allocation2], 4294967280 }
   0xe   :  { %12 = sfence }
   0xf   :  { %13 = vsyncpa [#allocation5], 0 }
  0x10   :  { %14 = vsyncpa [#allocation6], 0 }
  0x11   :  { %16 = vsyncpa [#allocation6 + $0x1], 0  ;;  %s423_s14 = smov 0   ;;  %s425_s15 = smov 0  }
  0x12   :  { %s427_s0 = smov 0   ;;  %s429_s16 = smov 0  }
  0x13 LB: > { %s444_s17 = sadd.s32 4294967295, %s394_s16   ;;  %s210_s18 = sadd.s32 4294967294, %s394_s16   ;;  %s394_s16 = sphi %s429_s16, %s566_s16   ;;  %s390_s0 = sphi %s427_s0, %s565_s0   ;;  %s386_s15 = sphi %s425_s15, %s564_s15   ;;  %s382_s14 = sphi %s423_s14, %s563_s14  }
  0x14   : > { %s448_s19 = sadd.s32 1, %s394_s16   ;;  %s50_s20 = sadd.s32 1, %s390_s0 }
  0x15   : > { %s47_s21 = ssub.s32 %s394_s16, %s448_s19  ;;  %p60_p5 = scmp.ne.s32.totalorder %s390_s0, %s386_s15 }
  0x16   : > { %p48_p6 = scmp.eq.s32.totalorder %s47_s21, 0  ;;  %p61_p7 = scmp.eq.s32.totalorder %s444_s17, 1 }
  0x17   : > { %p66_p8 = scmp.ne.s32.totalorder %s386_s15, %s382_s14  ;;  %p67_p9 = scmp.eq.s32.totalorder %s210_s18, 1 }
  0x18   : > { %s459_s22 = scalar_select %p48_p6, %s390_s0, %s50_s20  }
  0x19   : > { %p461_p10 = por %p61_p7, %p60_p5  ;;  %p465_p11 = por %p67_p9, %p66_p8 }
  0x1a   : > { %p211_p12 = scmp.ge.s32.totalorder %s394_s16, 1  ;;  %p74_p13 = scmp.lt.s32.totalorder %s394_s16, 3 }
  0x1b   : > { %s554_s23 = scalar_select %p461_p10, 1, 0 }
  0x1c   : > { %s555_s24 = scalar_select %p465_p11, 1, 0 }
  0x1d   : > { %p551_p0 = scmp.eq.s32.totalorder %s444_s17, 0  ;;  %p472_p1 = pnand %p211_p12, %p74_p13 }
  0x1e   : > { %s401_s26 = smov [#allocation4]   ;;  %s294_s3 = scalar_lea.hbm %s549_s1, 512 }
  0x1f   : > { %s556_s25 = scalar_select %p472_p1, 1, 0 }
  0x20   : > { %s86_s27 = sshll.u32 %s401_s26, 4  ;;  %p227_p2 = pneg %p472_p1  ;;  %s87_s27 = int_to_ptr.vmem [resolvable:$true] %s86_s27 }
  0x21   : > { %p295_p4 = scmp.ne.s32.totalorder %s549_s1, %s294_s3  ;;  %p301_p8 = scmp.lt.u32.totalorder %s294_s3, %s549_s1 }
  0x22   : > { %p480_p3 = pnand %p551_p0, %p227_p2 }
  0x24   : > { %p296_p5 = pneg %p480_p3 }
  0x26   : > { %p297_p6 = pnand %p296_p5, %p295_p4 }
  0x28   : > { %p298_p7 = pneg %p297_p6 }
  0x2a   : > { %p303_p9 = pnand %p301_p8, %p298_p7 }
  0x2c   : > { %306 = shalt.err (!%p303_p9)
}
  0x2d   : > { %s307_s8 = scalar_lea.vmem %s87_s27, 512  ;;  %p315_p0 = scmp.lt.s32.totalorder %s87_s27, %s87_s27 }
  0x2e   : > { %p308_p12 = scmp.ne.s32.totalorder %s87_s27, %s307_s8  ;;  %p316_p11 = scmp.lt.s32.totalorder %s307_s8, %s307_s8 }
  0x30   : > { %p310_p13 = pnand %p308_p12, %p296_p5  ;;  %p317_p10 = por %p316_p11, %p315_p0 }
  0x32   : > { %p311_p2 = pneg %p310_p13 }
  0x34   : > { %p318_p1 = pnand %p317_p10, %p311_p2 }
  0x36   : > { %321 = shalt.err (!%p318_p1)
}
  0x37   : > { %s402_s9 = smov 128   ;;  %s403_s10 = smov 8  }
  0x38   : > { %230 = dma.hbm_to_vmem [thread:$0]  (!%p480_p3), %s549_s1, 512, %s87_s27, [#allocation5], %s402_s9, %s402_s9, %s403_s10  }
  0x39   : > { %p558_p4 = scmp.ne.s32.totalorder %s556_s25, 0 }
  0x3a   : > { %p559_p6 = scmp.eq.s32.totalorder (!%p558_p4), %s444_s17, 0 }
  0x3b   : > { %102 = sbr.rel (%p558_p4) target bundleno = 99 (0x63), region = 24 }
  0x42   : > { %373 = dma.done.wait (%p559_p6), [#allocation5], 512   ;;  %p560_p5 = pmov %p559_p6 }
  0x43   : > { %s114_s13 = sand.u32 1, %s386_s15   ;;  %s216_s18 = sshll.u32 %s444_s17, 3 }
  0x44   : > { %375 = vsyncadd (%p560_p5), [#allocation5], 4294966784  ;;  %s215_s20 = sshll.u32 %s114_s13, 3  ;;  %s396_s26 = smov 0  }
  0x45   : > { %s116_s21 = scalar_lea.vmem [#allocation7], %s215_s20 }
  0x46 LB: >> { %s124_s27 = sadd.s32 %s398_s26, %s216_s18  ;;  %s128_s25 = scalar_lea.vmem %s116_s21, %s398_s26 [#allocation7]  ;;  %s398_s26 = sphi %s396_s26, %s123_s26  }
  0x47   : >> { %s125_s28 = sld [smem:[#allocation3 + %s124_s27]]  ;;  %s123_s26 = sadd.s32 1, %s398_s26  }
  0x48   : >> { %p120_p10 = scmp.ge.s32.totalorder %s123_s26, 8  }
  0x49   : > { %s218_s30 = sshll.u32 (%p120_p10), %s444_s17, 7  ;;  %s144_s6 = sshll.u32 (%p120_p10), %s116_s21, 4  ;;  %s145_s6 = int_to_ptr.vmem [resolvable:$true] %s144_s6 }
  0x4a   : > { %122 = sbr.rel (!%p120_p10) target bundleno = 70 (0x46), region = 70  ;;  %s512_s5 = scalar_lea.hbm (%p120_p10), %s550_s2, %s218_s30 }
  0x4b   : > { %s131_s7 = scalar_lea.sflag (%p120_p10), [#allocation6], %s114_s13  ;;  %s322_s8 = scalar_lea.vmem (%p120_p10), %s145_s6, 128 }
  0x4c   : > { %p323_p11 = scmp.ne.s32.totalorder (%p120_p10), %s145_s6, %s322_s8  ;;  %p561_p0 = scmp.ne.s32.totalorder (%p120_p10), %s554_s23, 0 }
  0x4d   : >> { %s126_s29 = scalar_lea.vmem [#allocation4], %s125_s28  ;;  %s404_s9 = smov (%p120_p10), [#allocation7]  }
  0x4e   : >> { %v127_v0 = vld [vmem:[%s126_s29] sm:$0x1]  ;;  %p324_p1 = pnand (%p120_p10), %p323_p11, %p561_p0  ;;  %s326_s10 = sshll.u32 (%p120_p10), %s404_s9, 4  ;;  %s327_s10 = int_to_ptr.vmem [resolvable:$false] %s326_s10 }
  0x4f   : >> { %129 = vst [vmem:[%s128_s25] sm:$0x1] %v127_v0  ;;  %s328_s11 = scalar_lea.vmem (%p120_p10), %s327_s10, 256  ;;  %p329_p7 = scmp.lt.s32.totalorder (%p120_p10), %s145_s6, %s327_s10 }
  0x50   : > { %p325_p3 = pneg (%p120_p10), %p324_p1  ;;  %p330_p8 = scmp.lt.s32.totalorder (%p120_p10), %s328_s11, %s322_s8 }
  0x52   : > { %p331_p9 = por %p330_p8, %p329_p7 }
  0x54   : > { %p332_p12 = pnand %p331_p9, %p325_p3 }
  0x56   : > { %335 = shalt.err (!%p332_p12)
}
  0x57   : > { %s336_s17 = scalar_lea.hbm %s512_s5, 128  ;;  %s340_s18 = scalar_lea.hbm %s550_s2, 256 }
  0x58   : > { %p337_p13 = scmp.ne.s32.totalorder %s512_s5, %s336_s17  ;;  %p341_p6 = scmp.lt.u32.totalorder %s512_s5, %s550_s2 }
  0x59   : > { %p342_p5 = scmp.lt.u32.totalorder %s340_s18, %s336_s17  ;;  %p344_p11 = scmp.lt.u32.totalorder %s336_s17, %s512_s5 }
  0x5a   : > { %p338_p2 = pnand %p337_p13, %p561_p0 }
  0x5b   : > { %p343_p10 = por %p342_p5, %p341_p6 }
  0x5c   : > { %p339_p4 = pneg %p338_p2 }
  0x5d   : > { %p345_p1 = por %p344_p11, %p343_p10 }
  0x5f   : > { %p346_p3 = pnand %p345_p1, %p339_p4 }
  0x61   : > { %349 = shalt.err (!%p346_p3)
}
  0x62   : > { %225 = dma.vmem_to_hbm [thread:$0]  (%p561_p0), %s145_s6, 128, %s512_s5, %s131_s7  }
  0x63 PF: > { %p237_p7 = scmp.ge.s32.totalorder %s394_s16, 2  ;;  %s156_s26 = sand.u32 1, %s382_s14  }
  0x64   : > { %p562_p8 = scmp.ne.s32.totalorder %s555_s24, 0  ;;  %s157_s27 = scalar_lea.sflag [#allocation6], %s156_s26 }
  0x66   : > { %p232_p9 = pnand %p237_p7, %p562_p8 }
  0x68   : > { %377 = dma.done.wait (!%p232_p9), %s157_s27, 128  }
  0x69   : > { %379 = vsyncadd (!%p232_p9), %s157_s27, 4294967168  ;;  %p19_p12 = scmp.ge.s32.totalorder %s448_s19, 4   ;;  %s563_s14 = smov %s386_s15 }
  0x6a   : > { %s564_s15 = smov %s390_s0  ;;  %s565_s0 = smov %s459_s22 }
  0x6b   : > { %s566_s16 = smov %s448_s19  ;;  %21 = sbr.rel (!%p19_p12) target bundleno = 19 (0x13), region = 81 }
  0x72   :  { %162 = vsyncpa [#allocation5], 1 }
  0x73   :  { %164 = vsyncpa [#allocation5 + $0x1], 1 }
  0x74   :  { %165 = vsyncpa [#allocation6], 1 }
  0x75   :  { %167 = vsyncpa [#allocation6 + $0x1], 1 }

</bundles_post_ra>
